<compile_context>
chip_gen: v7x
topology: tpu7x:2x2x1
jax: 0.10.0
libtpu: 0.0.40
codegen_flags: <defaults>
</compile_context>

<pallas_src>
import jax
import jax.numpy as jnp
from jax.experimental import pallas as pl
from jax.experimental.pallas import tpu as pltpu

HIDDEN1 = 512
HIDDEN2 = 128
OUTPUT_SIZE = 6

SUBLANE = 8
MAX_BATCH_TILE = 512
MIN_SPLIT_ROWS = 256          # per-core MXU-filling minimum for the v7x split
X_VMEM_BUDGET = 16 << 20      # budget for the double-buffered x block


def mlp_kernel(x_ref, w1_ref, b1_ref, w2_ref, b2_ref, w3_ref, b3_ref, o_ref):
    # In-kernel cast of the activation to the weight dtype (bf16 path); this
    # is a no-op for f32 weights.  Accumulation / bias / ReLU stay f32.
    x = x_ref[...].astype(w1_ref.dtype)
    # Layer 1: (TB, D) @ (D, 512) + (1, 512), ReLU        -- MXU + VPU
    h1 = jnp.dot(x, w1_ref[...], preferred_element_type=jnp.float32)
    h1 = jnp.maximum(h1 + b1_ref[...], 0.0)
    # Layer 2: (TB, 512) @ (512, 128) + (1, 128), ReLU
    h2 = jnp.dot(h1.astype(w2_ref.dtype), w2_ref[...],
                 preferred_element_type=jnp.float32)
    h2 = jnp.maximum(h2 + b2_ref[...], 0.0)
    # Layer 3: (TB, 128) @ (128, 6) + (1, 6)   (narrow lane-masked store)
    out = jnp.dot(h2.astype(w3_ref.dtype), w3_ref[...],
                  preferred_element_type=jnp.float32)
    o_ref[...] = (out + b3_ref[...]).astype(o_ref.dtype)


def _round_up(x, m):
    return (x + m - 1) // m * m


def _num_tensorcores():
    """Best-effort detection of 2-TensorCore parts (v7x). v5e/v6e -> 1."""
    try:
        kind = jax.devices()[0].device_kind.lower()
    except Exception:
        return 1
    return 2 if ("v7" in kind or "7x" in kind) else 1


def _choose_batch_tile(B, D, x_itemsize):
    """Biggest useful tile (<= 512 rows, multiple of 8), VMEM-capped.

    Splitting the grid in two is only done on 2-TC parts and only when each
    half still fills the MXU (>= 256 rows); single-TC chips never split.
    """
    tile = min(MAX_BATCH_TILE, _round_up(B, SUBLANE))
    if (_num_tensorcores() >= 2
            and 2 * MIN_SPLIT_ROWS <= B <= MAX_BATCH_TILE):
        tile = _round_up(pl.cdiv(B, 2), SUBLANE)
    # Cap so the double-buffered x block stays inside its VMEM budget even
    # for very large D (relevant on v7x: 64 MiB physical / 32 MiB scoped).
    cap = (X_VMEM_BUDGET // max(1, 2 * D * x_itemsize)) // SUBLANE * SUBLANE
    return max(SUBLANE, min(tile, max(SUBLANE, cap)))


def _vmem_limit_bytes(batch_tile, D, H1, H2, N, x_itemsize, w_itemsize):
    x_bufs = 2 * batch_tile * D * x_itemsize                 # in, double-buffered
    o_bufs = 2 * batch_tile * N * 4                          # out, double-buffered
    w_bufs = 2 * ((D * H1 + H1 * H2 + H2 * N) * w_itemsize   # weights + biases
                  + (H1 + H2 + N) * 4)
    interm = batch_tile * (H1 + H2 + 128) * 4                # live h1/h2/out values
    est = x_bufs + o_bufs + w_bufs + interm
    # Generous headroom, never above v7x's 64 MiB physical VMEM.
    return int(min(64 << 20, max(2 * est, 16 << 20)))


def counting_network_forward(x, params, *, batch_tile=None, use_bf16=False):
    """CountingNetwork forward pass as one fused Pallas kernel.

    x: (B, input_size) float32
    params: dict of w1 (D,512), b1 (1,512), w2 (512,128), b2 (1,128),
            w3 (128,6), b3 (1,6)
    """
    w1, b1, w2, b2, w3, b3 = (
        params["w1"], params["b1"], params["w2"],
        params["b2"], params["w3"], params["b3"],
    )
    B, D = x.shape
    H1 = w1.shape[1]
    H2 = w2.shape[1]
    N = w3.shape[1]

    if use_bf16:
        # Cast only the (tiny) weights in the wrapper; x is cast in-kernel so
        # there is no extra full-activation HBM pass.
        w1 = w1.astype(jnp.bfloat16)
        w2 = w2.astype(jnp.bfloat16)
        w3 = w3.astype(jnp.bfloat16)

    if batch_tile is None:
        batch_tile = _choose_batch_tile(B, D, x.dtype.itemsize)
    assert batch_tile % SUBLANE == 0, "batch_tile must be a multiple of 8"

    grid = (pl.cdiv(B, batch_tile),)

    # Weights/biases are small: every grid step sees the full arrays (block
    # index 0); only the activation tile walks over the batch axis.  Blocks
    # use full-extent last dims, so no lane padding of x / w / output at all.
    def full(a):
        return pl.BlockSpec(a.shape, lambda i: (0,) * a.ndim)

    vmem_limit = _vmem_limit_bytes(batch_tile, D, H1, H2, N,
                                   x.dtype.itemsize, w1.dtype.itemsize)

    out = pl.pallas_call(
        mlp_kernel,
        out_shape=jax.ShapeDtypeStruct((B, N), jnp.float32),
        grid_spec=pltpu.PrefetchScalarGridSpec(
            num_scalar_prefetch=0,
            grid=grid,
            in_specs=[
                pl.BlockSpec((batch_tile, D), lambda i: (i, 0)),   # x, unpadded
                full(w1), full(b1),
                full(w2), full(b2),
                full(w3), full(b3),
            ],
            out_specs=pl.BlockSpec((batch_tile, N), lambda i: (i, 0)),
        ),
        compiler_params=pltpu.CompilerParams(
            dimension_semantics=("parallel",),
            vmem_limit_bytes=vmem_limit,
        ),
    )(x, w1, b1, w2, b2, w3, b3)

    return out


def init_params(key, input_size):
    """Deterministic parameter init (shapes from CountingNetwork.__init__)."""
    k1, k2, k3, k4, k5, k6 = jax.random.split(key, 6)

    def uniform(k, shape, fan_in):
        # mimic PyTorch's default U(-1/sqrt(fan_in), 1/sqrt(fan_in))
        bound = 1.0 / jnp.sqrt(jnp.float32(fan_in))
        return jax.random.uniform(k, shape, jnp.float32, -bound, bound)

    return {
        "w1": uniform(k1, (input_size, HIDDEN1), input_size),
        "b1": uniform(k2, (1, HIDDEN1), input_size),
        "w2": uniform(k3, (HIDDEN1, HIDDEN2), HIDDEN1),
        "b2": uniform(k4, (1, HIDDEN2), HIDDEN1),
        "w3": uniform(k5, (HIDDEN2, OUTPUT_SIZE), HIDDEN2),
        "b3": uniform(k6, (1, OUTPUT_SIZE), HIDDEN2),
    }


def reference_forward(x, p):
    h1 = jnp.maximum(x @ p["w1"] + p["b1"], 0.0)
    h2 = jnp.maximum(h1 @ p["w2"] + p["b2"], 0.0)
    return h2 @ p["w3"] + p["b3"]


if __name__ == "__main__":
    key = jax.random.PRNGKey(0)
    kx, kp, kx2 = jax.random.split(key, 3)

    batch = 16
    input_size = 32

    x = jax.random.normal(kx, (batch, input_size), jnp.float32)
    params = init_params(kp, input_size)

    # Case 1: f32, aligned batch (single grid step, unpadded x / narrow out).
    out = jax.block_until_ready(counting_network_forward(x, params))
    ref = reference_forward(x, params)
    assert out.shape == (batch, OUTPUT_SIZE)
    assert jnp.allclose(out, ref, atol=1e-4, rtol=1e-4), "f32 mismatch vs reference"

    # Case 2: ragged batch (30 rows) exercises the masked partial last block.
    x2 = jax.random.normal(kx2, (30, input_size), jnp.float32)
    out2 = jax.block_until_ready(counting_network_forward(x2, params))
    ref2 = reference_forward(x2, params)
    assert out2.shape == (30, OUTPUT_SIZE)
    assert jnp.allclose(out2, ref2, atol=1e-4, rtol=1e-4), "ragged-batch mismatch"

    # Case 3: bf16 weights + in-kernel bf16 activation cast, looser tolerance.
    out3 = jax.block_until_ready(
        counting_network_forward(x, params, use_bf16=True))
    assert out3.shape == (batch, OUTPUT_SIZE)
    assert jnp.allclose(out3, ref, atol=2e-1, rtol=5e-2), "bf16 mismatch"

    print("KERNEL_OK")
</pallas_src>

<mosaic_0001>
module attributes {stable_mosaic.version = 11 : i64} {
  func.func @mlp_kernel(%arg0: i32, %arg1: memref<16x32xf32, #tpu.memory_space<vmem>>, %arg2: memref<32x512xf32, #tpu.memory_space<vmem>>, %arg3: memref<1x512xf32, #tpu.memory_space<vmem>>, %arg4: memref<512x128xf32, #tpu.memory_space<vmem>>, %arg5: memref<1x128xf32, #tpu.memory_space<vmem>>, %arg6: memref<128x6xf32, #tpu.memory_space<vmem>>, %arg7: memref<1x6xf32, #tpu.memory_space<vmem>>, %arg8: memref<16x6xf32, #tpu.memory_space<vmem>>) attributes {dimension_semantics = [#tpu.dimension_semantics<parallel>], iteration_bounds = array<i64: 1>, scalar_prefetch = 0 : i64, scratch_operands = 0 : i64, tpu.core_type = #tpu.core_type<tc>, window_params = [{transform_indices = @transform_0, window_bounds = array<i64: 16, 32>}, {pipeline_mode = #tpu.pipeline_mode<synchronous>, transform_indices = @transform_1, window_bounds = array<i64: 32, 512>}, {pipeline_mode = #tpu.pipeline_mode<synchronous>, transform_indices = @transform_2, window_bounds = array<i64: 1, 512>}, {pipeline_mode = #tpu.pipeline_mode<synchronous>, transform_indices = @transform_3, window_bounds = array<i64: 512, 128>}, {pipeline_mode = #tpu.pipeline_mode<synchronous>, transform_indices = @transform_4, window_bounds = array<i64: 1, 128>}, {pipeline_mode = #tpu.pipeline_mode<synchronous>, transform_indices = @transform_5, window_bounds = array<i64: 128, 6>}, {pipeline_mode = #tpu.pipeline_mode<synchronous>, transform_indices = @transform_6, window_bounds = array<i64: 1, 6>}, {transform_indices = @transform_7, window_bounds = array<i64: 16, 6>}]} {
    %c0 = arith.constant 0 : index
    %c0_0 = arith.constant 0 : index
    %0 = vector.load %arg1[%c0, %c0_0] : memref<16x32xf32, #tpu.memory_space<vmem>>, vector<16x32xf32>
    %c0_1 = arith.constant 0 : index
    %c0_2 = arith.constant 0 : index
    %1 = vector.load %arg2[%c0_1, %c0_2] : memref<32x512xf32, #tpu.memory_space<vmem>>, vector<32x512xf32>
    %cst = arith.constant dense<0.000000e+00> : vector<16x512xf32>
    %2 = tpu.matmul %0, %1, %cst {dimension_numbers = #tpu.dot_dimension_numbers<[1], [0], [0], [1], [0, 0, 1, 1], [], []>} : vector<16x32xf32>, vector<32x512xf32>, vector<16x512xf32> -> vector<16x512xf32>
    %c0_3 = arith.constant 0 : index
    %c0_4 = arith.constant 0 : index
    %3 = vector.load %arg3[%c0_3, %c0_4] : memref<1x512xf32, #tpu.memory_space<vmem>>, vector<1x512xf32>
    %4 = vector.broadcast %3 : vector<1x512xf32> to vector<16x512xf32>
    %5 = arith.addf %2, %4 : vector<16x512xf32>
    %cst_5 = arith.constant 0.000000e+00 : f32
    %6 = vector.broadcast %cst_5 : f32 to vector<16x512xf32>
    %7 = arith.maximumf %5, %6 : vector<16x512xf32>
    %c0_6 = arith.constant 0 : index
    %c0_7 = arith.constant 0 : index
    %8 = vector.load %arg4[%c0_6, %c0_7] : memref<512x128xf32, #tpu.memory_space<vmem>>, vector<512x128xf32>
    %cst_8 = arith.constant dense<0.000000e+00> : vector<16x128xf32>
    %9 = tpu.matmul %7, %8, %cst_8 {dimension_numbers = #tpu.dot_dimension_numbers<[1], [0], [0], [1], [0, 0, 1, 1], [], []>} : vector<16x512xf32>, vector<512x128xf32>, vector<16x128xf32> -> vector<16x128xf32>
    %c0_9 = arith.constant 0 : index
    %c0_10 = arith.constant 0 : index
    %10 = vector.load %arg5[%c0_9, %c0_10] : memref<1x128xf32, #tpu.memory_space<vmem>>, vector<1x128xf32>
    %11 = vector.broadcast %10 : vector<1x128xf32> to vector<16x128xf32>
    %12 = arith.addf %9, %11 : vector<16x128xf32>
    %cst_11 = arith.constant 0.000000e+00 : f32
    %13 = vector.broadcast %cst_11 : f32 to vector<16x128xf32>
    %14 = arith.maximumf %12, %13 : vector<16x128xf32>
    %c0_12 = arith.constant 0 : index
    %c0_13 = arith.constant 0 : index
    %15 = vector.load %arg6[%c0_12, %c0_13] : memref<128x6xf32, #tpu.memory_space<vmem>>, vector<128x6xf32>
    %cst_14 = arith.constant dense<0.000000e+00> : vector<16x6xf32>
    %16 = tpu.matmul %14, %15, %cst_14 {dimension_numbers = #tpu.dot_dimension_numbers<[1], [0], [0], [1], [0, 0, 1, 1], [], []>} : vector<16x128xf32>, vector<128x6xf32>, vector<16x6xf32> -> vector<16x6xf32>
    %c0_15 = arith.constant 0 : index
    %c0_16 = arith.constant 0 : index
    %17 = vector.load %arg7[%c0_15, %c0_16] : memref<1x6xf32, #tpu.memory_space<vmem>>, vector<1x6xf32>
    %18 = vector.broadcast %17 : vector<1x6xf32> to vector<16x6xf32>
    %19 = arith.addf %16, %18 : vector<16x6xf32>
    %c0_17 = arith.constant 0 : index
    %c0_18 = arith.constant 0 : index
    %20 = vector.load %arg8[%c0_17, %c0_18] : memref<16x6xf32, #tpu.memory_space<vmem>>, vector<16x6xf32>
    tpu.vector_store %arg8[%c0_17, %c0_18], %19 {strides = array<i32>} : memref<16x6xf32, #tpu.memory_space<vmem>>, vector<16x6xf32>,
    return
  }
  func.func @transform_0(%arg0: i32) -> (i32, i32) {
    %c0_i32 = arith.constant 0 : i32
    %c0_i32_0 = arith.constant 0 : i32
    return %arg0, %c0_i32 : i32, i32
  }
  func.func @transform_1(%arg0: i32) -> (i32, i32) {
    %c0_i32 = arith.constant 0 : i32
    %c0_i32_0 = arith.constant 0 : i32
    %c0_i32_1 = arith.constant 0 : i32
    return %c0_i32, %c0_i32_0 : i32, i32
  }
  func.func @transform_2(%arg0: i32) -> (i32, i32) {
    %c0_i32 = arith.constant 0 : i32
    %c0_i32_0 = arith.constant 0 : i32
    %c0_i32_1 = arith.constant 0 : i32
    return %c0_i32, %c0_i32_0 : i32, i32
  }
  func.func @transform_3(%arg0: i32) -> (i32, i32) {
    %c0_i32 = arith.constant 0 : i32
    %c0_i32_0 = arith.constant 0 : i32
    %c0_i32_1 = arith.constant 0 : i32
    return %c0_i32, %c0_i32_0 : i32, i32
  }
  func.func @transform_4(%arg0: i32) -> (i32, i32) {
    %c0_i32 = arith.constant 0 : i32
    %c0_i32_0 = arith.constant 0 : i32
    %c0_i32_1 = arith.constant 0 : i32
    return %c0_i32, %c0_i32_0 : i32, i32
  }
  func.func @transform_5(%arg0: i32) -> (i32, i32) {
    %c0_i32 = arith.constant 0 : i32
    %c0_i32_0 = arith.constant 0 : i32
    %c0_i32_1 = arith.constant 0 : i32
    return %c0_i32, %c0_i32_0 : i32, i32
  }
  func.func @transform_6(%arg0: i32) -> (i32, i32) {
    %c0_i32 = arith.constant 0 : i32
    %c0_i32_0 = arith.constant 0 : i32
    %c0_i32_1 = arith.constant 0 : i32
    return %c0_i32, %c0_i32_0 : i32, i32
  }
  func.func @transform_7(%arg0: i32) -> (i32, i32) {
    %c0_i32 = arith.constant 0 : i32
    %c0_i32_0 = arith.constant 0 : i32
    return %arg0, %c0_i32 : i32, i32
  }
}

</mosaic_0001>

<bundles_post_ra>
// kernel: tpu_custom_call.1
= control target key start
LH: loop header
LB: loop body
LE: loop exit
PB: predicated region body
PF: predicated region fallthrough
CT: control target
= control target key end

     0   :  { %12 = vsyncpa [#allocation3], 0  ;;  %s1085_s0 = inlined_call_operand.hbm [shape: f32[16,32], index: 0, kind: input, shape index: {}]   ;;  %s1086_s1 = inlined_call_operand.vmem [shape: f32[32,512], index: 1, kind: input, shape index: {}]   ;;  %s1087_s2 = inlined_call_operand.vmem [shape: f32[1,512], index: 2, kind: input, shape index: {}]   ;;  %s1088_s3 = inlined_call_operand.hbm [shape: f32[512,128], index: 3, kind: input, shape index: {}]   ;;  %s1089_s4 = inlined_call_operand.vmem [shape: f32[1,128], index: 4, kind: input, shape index: {}]   ;;  %s1090_s5 = inlined_call_operand.vmem [shape: f32[128,6], index: 5, kind: input, shape index: {}]   ;;  %s1091_s6 = inlined_call_operand.vmem [shape: f32[1,6], index: 6, kind: input, shape index: {}]   ;;  %s1092_s7 = inlined_call_operand.vmem [shape: f32[16,6], index: 7, kind: output, shape index: {}]  }
   0x1   :  { %13 = vsyncpa [#allocation5], 0  ;;  %s893_s24 = smov [#allocation2]   ;;  %s845_s28 = scalar_lea.hbm %s1085_s0, 256 }
   0x2   :  { %s19_s25 = sshll.u32 %s893_s24, 4  ;;  %p846_p0 = scmp.ne.s32.totalorder %s1085_s0, %s845_s28  ;;  %s20_s25 = int_to_ptr.vmem [resolvable:$true] %s19_s25 }
   0x3   :  { %p849_p1 = scmp.lt.u32.totalorder %s845_s28, %s1085_s0 }
   0x5   :  { %p851_p2 = pnand %p849_p1, %p846_p0 }
   0x7   :  { %854 = shalt.err (!%p851_p2)
}
   0x8   :  { %s855_s10 = scalar_lea.vmem %s20_s25, 256  ;;  %p860_p4 = scmp.lt.s32.totalorder %s20_s25, %s20_s25 }
   0x9   :  { %p856_p3 = scmp.ne.s32.totalorder %s20_s25, %s855_s10  ;;  %p861_p5 = scmp.lt.s32.totalorder %s855_s10, %s855_s10 }
   0xb   :  { %p862_p6 = por %p861_p5, %p860_p4 }
   0xd   :  { %p863_p7 = pnand %p862_p6, %p856_p3 }
   0xf   :  { %866 = shalt.err (!%p863_p7)
}
  0x10   :  { %s894_s11 = smov 128   ;;  %s895_s12 = smov 8  }
  0x11   :  { %25 = dma.hbm_to_vmem [thread:$0]  %s1085_s0, 256, %s20_s25, [#allocation3], %s894_s11, %s894_s11, %s895_s12  }
  0x12   :  { %s896_s15 = smov [#allocation4]   ;;  %s867_s19 = scalar_lea.hbm %s1088_s3, 8192 }
  0x13   :  { %s35_s16 = sshll.u32 %s896_s15, 4  ;;  %p868_p8 = scmp.ne.s32.totalorder %s1088_s3, %s867_s19  ;;  %s36_s16 = int_to_ptr.vmem [resolvable:$true] %s35_s16 }
  0x14   :  { %p871_p9 = scmp.lt.u32.totalorder %s867_s19, %s1088_s3 }
  0x16   :  { %p873_p10 = pnand %p871_p9, %p868_p8 }
  0x18   :  { %876 = shalt.err (!%p873_p10)
}
  0x19   :  { %s877_s24 = scalar_lea.vmem %s36_s16, 8192  ;;  %p882_p12 = scmp.lt.s32.totalorder %s36_s16, %s36_s16 }
  0x1a   :  { %p878_p11 = scmp.ne.s32.totalorder %s36_s16, %s877_s24  ;;  %p883_p13 = scmp.lt.s32.totalorder %s877_s24, %s877_s24 }
  0x1c   :  { %p884_p0 = por %p883_p13, %p882_p12 }
  0x1e   :  { %p885_p1 = pnand %p884_p0, %p878_p11 }
  0x20   :  { %888 = shalt.err (!%p885_p1)
}
  0x21   :  { %41 = dma.hbm_to_vmem [thread:$0]  %s1088_s3, 8192, %s36_s16, [#allocation5], %s894_s11, %s894_s11, %s895_s12  }
  0x22   :  { %889 = dma.done.wait [#allocation3], 256  }
  0x23   :  { %890 = vsyncadd [#allocation3], 4294967040 }
  0x24   :  { %891 = dma.done.wait [#allocation5], 8192  }
  0x25   :  { %892 = vsyncadd [#allocation5], 4294959104  ;;  %v897_v0 = vmov 0.0   ;;  %v57_v1 = vld [vmem:[%s1086_s1 + $0x8] sm:$0xff]  ;;  %v56_v3 = vld [vmem:[%s1086_s1] sm:$0xff]  ;;  %vm94_vm0 = vcmask 261120  }
  0x26   :  { %165 = vmatprep.mubr.f32.mxu1 %v897_v0  ;;  %v61_v2 = vld [vmem:[%s1086_s1 + $0x28] sm:$0xff]  ;;  %v60_v5 = vld [vmem:[%s1086_s1 + $0x20] sm:$0xff]  ;;  %v59_v12 = vld [vmem:[%s1086_s1 + $0x18] sm:$0xff]  ;;  %vm584_vm1 = vcmask 48128  }
  0x27   :  { %v728_v4 = vpack.c.bf16 %v61_v2, %v57_v1  ;;  %v65_v6 = vld [vmem:[%s1086_s1 + $0x48] sm:$0xff]  ;;  %v730_v8 = vpack.c.bf16 %v60_v5, %v56_v3  ;;  %v64_v10 = vld [vmem:[%s1086_s1 + $0x40] sm:$0xff]  ;;  %v63_v13 = vld [vmem:[%s1086_s1 + $0x38] sm:$0xff] }
  0x28   :  { %v69_v7 = vld [vmem:[%s1086_s1 + $0x68] sm:$0xff]  ;;  %v68_v11 = vld [vmem:[%s1086_s1 + $0x60] sm:$0xff]  ;;  %v58_v15 = vld [vmem:[%s1086_s1 + $0x10] sm:$0xff]  ;;  %v736_v16 = vpack.c.bf16 %v63_v13, %v59_v12 }
  0x29   :  { %v732_v9 = vpack.c.bf16 %v69_v7, %v65_v6  ;;  %729 = vmatprep.subr.bf16.mxu1 %v728_v4  ;;  %v734_v14 = vpack.c.bf16 %v68_v11, %v64_v10  ;;  %v62_v17 = vld [vmem:[%s1086_s1 + $0x30] sm:$0xff]  ;;  %v67_v18 = vld [vmem:[%s1086_s1 + $0x58] sm:$0xff]  ;;  %v1005_v20 = vld [vmem:[#allocation2] sm:$0xff] }
  0x2a   :  { %731 = vmatpush1.bf16.msra.mxu1 %v730_v8  ;;  %v71_v19 = vld [vmem:[%s1086_s1 + $0x78] sm:$0xff]  ;;  %v279_v21 = vld [vmem:[#allocation4 + $0x80] sm:$0xff]  ;;  %v281_v26 = vld [vmem:[#allocation4 + $0x90] sm:$0xff]  ;;  %v738_v28 = vpack.c.bf16 %v62_v17, %v58_v15 }
  0x2b   :  { %733 = vmatprep.subr.bf16.mxu1 %v732_v9  ;;  %v280_v22 = vld [vmem:[#allocation4 + $0x88] sm:$0xff]  ;;  %v263_v23 = vld [vmem:[#allocation4] sm:$0xff]  ;;  %v282_v27 = vld [vmem:[#allocation4 + $0x98] sm:$0xff]  ;;  %v740_v34 = vpack.c.bf16 %v71_v19, %v67_v18 }
  0x2c   :  { %v744_v24 = vpack.c.bf16 %v280_v22, %v279_v21  ;;  %v264_v25 = vld [vmem:[#allocation4 + $0x8] sm:$0xff]  ;;  %v748_v30 = vpack.c.bf16 %v282_v27, %v281_v26  ;;  %v265_v31 = vld [vmem:[#allocation4 + $0x10] sm:$0xff]  ;;  %v266_v32 = vld [vmem:[#allocation4 + $0x18] sm:$0xff] }
  0x2d   :  { %v746_v29 = vpack.c.bf16 %v264_v25, %v263_v23  ;;  %v283_v33 = vld [vmem:[#allocation4 + $0xa0] sm:$0xff]  ;;  %v284_v37 = vld [vmem:[#allocation4 + $0xa8] sm:$0xff]  ;;  %v750_v38 = vpack.c.bf16 %v266_v32, %v265_v31  ;;  %v55_v44 = vld [vmem:[#allocation2 + $0x8] sm:$0xff] }
  0x2e   :  { %735 = vmatpush1.bf16.msra.mxu1 %v734_v14  ;;  %v66_v35 = vld [vmem:[%s1086_s1 + $0x50] sm:$0xff]  ;;  %745 = vmatprep.subr.bf16.mxu0 %v744_v24  ;;  %v312_v40 = vld [vmem:[#allocation4 + $0x188] sm:$0xff]  ;;  %v752_v41 = vpack.c.bf16 %v284_v37, %v283_v33  ;;  %v285_v46 = vld [vmem:[#allocation4 + $0xb0] sm:$0xff] }
  0x2f   :  { %737 = vmatprep.subr.bf16.mxu1 %v736_v16  ;;  %v70_v36 = vld [vmem:[%s1086_s1 + $0x70] sm:$0xff]  ;;  %747 = vmatpush3.bf16.msra.mxu0 %v746_v29  ;;  %v268_v43 = vld [vmem:[#allocation4 + $0x28] sm:$0xff]  ;;  %v286_v47 = vld [vmem:[#allocation4 + $0xb8] sm:$0xff] }
  0x30   :  { %v311_v39 = vld [vmem:[#allocation4 + $0x180] sm:$0xff]  ;;  %749 = vmatprep.subr.bf16.mxu0 %v748_v30  ;;  %v742_v45 = vpack.c.bf16 %v70_v36, %v66_v35  ;;  %v296_v50 = vld [vmem:[#allocation4 + $0x108] sm:$0xff]  ;;  %v313_v52 = vld [vmem:[#allocation4 + $0x190] sm:$0xff]  ;;  %v756_v54 = vpack.c.bf16 %v286_v47, %v285_v46 }
  0x31   :  { %593 = vmatmul.mubr.msk.f32.vlgmr.msra.gmra.mrb[0].mxu1 %vm94_vm0, %v1005_v20  ;;  %v267_v42 = vld [vmem:[#allocation4 + $0x20] sm:$0xff]  ;;  %v776_v48 = vpack.c.bf16 %v312_v40, %v311_v39  ;;  %v314_v53 = vld [vmem:[#allocation4 + $0x198] sm:$0xff]  ;;  %v269_v55 = vld [vmem:[#allocation4 + $0x30] sm:$0xff] }
  0x32   :  { %739 = vmatpush1.bf16.msra.mxu1 %v738_v28  ;;  %171 = vmatprep.mubr.f32.mxu1 %v897_v0  ;;  %v295_v49 = vld [vmem:[#allocation4 + $0x100] sm:$0xff]  ;;  %v754_v51 = vpack.c.bf16 %v268_v43, %v267_v42  ;;  %v270_v56 = vld [vmem:[#allocation4 + $0x38] sm:$0xff]  ;;  %v288_v59 = vld [vmem:[#allocation4 + $0xc8] sm:$0xff]  ;;  %v780_v60 = vpack.c.bf16 %v314_v53, %v313_v52 }
  0x33   :  { %741 = vmatprep.subr.bf16.mxu1 %v740_v34  ;;  %751 = vmatpush3.bf16.msra.mxu0 %v750_v38  ;;  %v778_v57 = vpack.c.bf16 %v296_v50, %v295_v49  ;;  %v287_v58 = vld [vmem:[#allocation4 + $0xc0] sm:$0xff]  ;;  %v297_v61 = vld [vmem:[#allocation4 + $0x110] sm:$0xff]  ;;  %v298_v62 = vld [vmem:[#allocation4 + $0x118] sm:$0xff]  ;;  %v758_v63 = vpack.c.bf16 %v270_v56, %v269_v55 }
  0x34   :  { %753 = vmatprep.subr.bf16.mxu0 %v752_v41  ;;  %v315_v1 = vld [vmem:[#allocation4 + $0x1a0] sm:$0xff]  ;;  %v316_v2 = vld [vmem:[#allocation4 + $0x1a8] sm:$0xff]  ;;  %v760_v3 = vpack.c.bf16 %v288_v59, %v287_v58  ;;  %v782_v6 = vpack.c.bf16 %v298_v62, %v297_v61  ;;  %v289_v7 = vld [vmem:[#allocation4 + $0xd0] sm:$0xff]  ;;  %v74_v62 = vlaneseq }
  0x35   :  { %594 = vmatmul.mubr.msk.f32.gmra.mrb[2].mxu1 %vm94_vm0, %v55_v44  ;;  %v271_v4 = vld [vmem:[#allocation4 + $0x40] sm:$0xff]  ;;  %v272_v5 = vld [vmem:[#allocation4 + $0x48] sm:$0xff]  ;;  %v290_v8 = vld [vmem:[#allocation4 + $0xd8] sm:$0xff]  ;;  %v784_v9 = vpack.c.bf16 %v316_v2, %v315_v1 }
  0x36   :  { %743 = vmatpush1.bf16.msra.mxu1 %v742_v45  ;;  %242 = vmatprep.mubr.f32.mxu1 %v897_v0  ;;  %v299_v10 = vld [vmem:[#allocation4 + $0x120] sm:$0xff]  ;;  %v300_v11 = vld [vmem:[#allocation4 + $0x128] sm:$0xff]  ;;  %v762_v12 = vpack.c.bf16 %v272_v5, %v271_v4  ;;  %v317_v13 = vld [vmem:[#allocation4 + $0x1b0] sm:$0xff]  ;;  %v764_v15 = vpack.c.bf16 %v290_v8, %v289_v7 }
  0x37   :  { %777 = vmatprep.subr.bf16.mxu1 %v776_v48  ;;  %755 = vmatpush3.bf16.msra.mxu0 %v754_v51  ;;  %v318_v14 = vld [vmem:[#allocation4 + $0x1b8] sm:$0xff]  ;;  %v273_v16 = vld [vmem:[#allocation4 + $0x50] sm:$0xff]  ;;  %v291_v18 = vld [vmem:[#allocation4 + $0xe0] sm:$0xff] }
  0x38   :  { %757 = vmatprep.subr.bf16.mxu0 %v756_v54  ;;  %v274_v17 = vld [vmem:[#allocation4 + $0x58] sm:$0xff]  ;;  %v292_v19 = vld [vmem:[#allocation4 + $0xe8] sm:$0xff]  ;;  %v301_v21 = vld [vmem:[#allocation4 + $0x130] sm:$0xff] }
  0x39   :  { %595 = vmatmul.mubr.msk.f32.vlgmr.msra.gmra.mrb[4].mxu1 %vm94_vm0, %v1005_v20  ;;  %v788_v20 = vpack.c.bf16 %v318_v14, %v317_v13  ;;  %v302_v22 = vld [vmem:[#allocation4 + $0x138] sm:$0xff]  ;;  %v766_v23 = vpack.c.bf16 %v274_v17, %v273_v16  ;;  %v319_v24 = vld [vmem:[#allocation4 + $0x1c0] sm:$0xff]  ;;  %v320_v25 = vld [vmem:[#allocation4 + $0x1c8] sm:$0xff]  ;;  %v768_v26 = vpack.c.bf16 %v292_v19, %v291_v18 }
  0x3a   :  { %248 = vmatprep.mubr.f32.mxu1 %v897_v0  ;;  %779 = vmatpush3.bf16.msra.mxu1 %v778_v57  ;;  %v786_v0 = vpack.c.bf16 %v300_v11, %v299_v10  ;;  %v790_v27 = vpack.c.bf16 %v302_v22, %v301_v21  ;;  %v792_v28 = vpack.c.bf16 %v320_v25, %v319_v24  ;;  %v275_v29 = vld [vmem:[#allocation4 + $0x60] sm:$0xff]  ;;  %v276_v30 = vld [vmem:[#allocation4 + $0x68] sm:$0xff]  ;;  %v293_v35 = vld [vmem:[#allocation4 + $0xf0] sm:$0xff] }
  0x3b   :  { %781 = vmatprep.subr.bf16.mxu1 %v780_v60  ;;  %759 = vmatpush3.bf16.msra.mxu0 %v758_v63  ;;  %v303_v31 = vld [vmem:[#allocation4 + $0x140] sm:$0xff]  ;;  %v770_v32 = vpack.c.bf16 %v276_v30, %v275_v29  ;;  %v304_v33 = vld [vmem:[#allocation4 + $0x148] sm:$0xff]  ;;  %v294_v36 = vld [vmem:[#allocation4 + $0xf8] sm:$0xff]  ;;  %v75_v63 = vshrl.u32 %v74_v62, 7 }
  0x3c   :  { %761 = vmatprep.subr.bf16.mxu0 %v760_v3  ;;  %v794_v34 = vpack.c.bf16 %v304_v33, %v303_v31  ;;  %v321_v37 = vld [vmem:[#allocation4 + $0x1d0] sm:$0xff]  ;;  %v772_v38 = vpack.c.bf16 %v294_v36, %v293_v35  ;;  %v322_v39 = vld [vmem:[#allocation4 + $0x1d8] sm:$0xff]  ;;  %v323_v47 = vld [vmem:[#allocation4 + $0x1e0] sm:$0xff] }
  0x3d   :  { %596 = vmatmul.mubr.msk.f32.gmra.mrb[6].mxu1 %vm94_vm0, %v55_v44  ;;  %v277_v40 = vld [vmem:[#allocation4 + $0x70] sm:$0xff]  ;;  %v278_v41 = vld [vmem:[#allocation4 + $0x78] sm:$0xff]  ;;  %v796_v42 = vpack.c.bf16 %v322_v39, %v321_v37  ;;  %v324_v48 = vld [vmem:[#allocation4 + $0x1e8] sm:$0xff]  ;;  %v76_v1 = vsub.s32 0, %v75_v63  ;;  %v80_v3 = vsub.s32 1, %v75_v63  ;;  %v88_v11 = vsub.s32 3, %v75_v63 }
  0x3e   :  { %783 = vmatpush3.bf16.msra.mxu1 %v782_v6  ;;  %v774_v43 = vpack.c.bf16 %v278_v41, %v277_v40  ;;  %v305_v44 = vld [vmem:[#allocation4 + $0x150] sm:$0xff]  ;;  %v306_v45 = vld [vmem:[#allocation4 + $0x158] sm:$0xff]  ;;  %v800_v49 = vpack.c.bf16 %v324_v48, %v323_v47  ;;  %v307_v50 = vld [vmem:[#allocation4 + $0x160] sm:$0xff] }
  0x3f   :  { %785 = vmatprep.subr.bf16.mxu1 %v784_v9  ;;  %763 = vmatpush3.bf16.msra.mxu0 %v762_v12  ;;  %v798_v46 = vpack.c.bf16 %v306_v45, %v305_v44  ;;  %v308_v51 = vld [vmem:[#allocation4 + $0x168] sm:$0xff]  ;;  %v325_v53 = vld [vmem:[#allocation4 + $0x1f0] sm:$0xff]  ;;  %v326_v54 = vld [vmem:[#allocation4 + $0x1f8] sm:$0xff]  ;;  %v84_v9 = vsub.s32 2, %v75_v63 }
  0x40   :  { %765 = vmatprep.subr.bf16.mxu0 %v764_v15  ;;  %v802_v52 = vpack.c.bf16 %v308_v51, %v307_v50  ;;  %v804_v55 = vpack.c.bf16 %v326_v54, %v325_v53  ;;  %v309_v56 = vld [vmem:[#allocation4 + $0x170] sm:$0xff]  ;;  %v310_v57 = vld [vmem:[#allocation4 + $0x178] sm:$0xff]  ;;  %v488_v12 = vld [vmem:[%s1090_s5 + $0x10] sm:$0xff] }
  0x41   :  { %v806_v58 = vpack.c.bf16 %v310_v57, %v309_v56  ;;  %v486_v59 = vld [vmem:[%s1090_s5] sm:$0xff]  ;;  %v487_v60 = vld [vmem:[%s1090_s5 + $0x8] sm:$0xff]  ;;  %v489_v13 = vld [vmem:[%s1090_s5 + $0x18] sm:$0xff] }
  0x42   :  { %787 = vmatpush3.bf16.msra.mxu1 %v786_v0  ;;  %v808_v61 = vpack.c.bf16 %v487_v60, %v486_v59  ;;  %v72_v2 = vld [vmem:[%s1087_s2] sm:$0xf]  ;;  %v812_v19 = vpack.c.bf16 %v489_v13, %v488_v12  ;;  %v492_v39 = vld [vmem:[%s1090_s5 + $0x30] sm:$0xff]  ;;  %v493_v40 = vld [vmem:[%s1090_s5 + $0x38] sm:$0xff] }
  0x43   :  { %789 = vmatprep.subr.bf16.mxu1 %v788_v20  ;;  %767 = vmatpush3.bf16.msra.mxu0 %v766_v23  ;;  %v77_v4 = vrot.slane %v72_v2, %v76_v1  ;;  %v81_v5 = vrot.slane %v72_v2, %v80_v3  ;;  %v85_v18 = vrot.slane %v72_v2, %v84_v9  ;;  %v490_v22 = vld [vmem:[%s1090_s5 + $0x20] sm:$0xff]  ;;  %v491_v23 = vld [vmem:[%s1090_s5 + $0x28] sm:$0xff]  ;;  %v496_v45 = vld [vmem:[%s1090_s5 + $0x50] sm:$0xff] }
  0x44   :  { %769 = vmatprep.subr.bf16.mxu0 %v768_v26  ;;  %v89_v21 = vrot.slane %v72_v2, %v88_v11  ;;  %v816_v29 = vpack.c.bf16 %v491_v23, %v490_v22  ;;  %v820_v41 = vpack.c.bf16 %v493_v40, %v492_v39  ;;  %v498_v48 = vld [vmem:[%s1090_s5 + $0x60] sm:$0xff]  ;;  %v500_v51 = vld [vmem:[%s1090_s5 + $0x70] sm:$0xff] }
  0x45   :  { %v597_v60 = vld [vmem:[%s1089_s4] ss:$0 sm:$0xff] }
  0x46   :  { %791 = vmatpush3.bf16.msra.mxu1 %v790_v27 }
  0x47   :  { %793 = vmatprep.subr.bf16.mxu1 %v792_v28  ;;  %771 = vmatpush3.bf16.msra.mxu0 %v770_v32 }
  0x48   :  { %773 = vmatprep.subr.bf16.mxu0 %v772_v38 }
  0x4a   :  { %795 = vmatpush3.bf16.msra.mxu1 %v794_v34 }
  0x4b   :  { %797 = vmatprep.subr.bf16.mxu1 %v796_v42  ;;  %775 = vmatpush3.bf16.msra.mxu0 %v774_v43  ;;  %v494_v42 = vld [vmem:[%s1090_s5 + $0x40] sm:$0xff]  ;;  %v495_v43 = vld [vmem:[%s1090_s5 + $0x48] sm:$0xff] }
  0x4c   :  { %809 = vmatprep.subr.bf16.mxu0 %v808_v61  ;;  %v824_v44 = vpack.c.bf16 %v495_v43, %v494_v42 }
  0x4e   :  { %799 = vmatpush3.bf16.msra.mxu1 %v798_v46  ;;  %v497_v46 = vld [vmem:[%s1090_s5 + $0x58] sm:$0xff] }
  0x4f   :  { %801 = vmatprep.subr.bf16.mxu1 %v800_v49  ;;  %v828_v47 = vpack.c.bf16 %v497_v46, %v496_v45  ;;  %v499_v49 = vld [vmem:[%s1090_s5 + $0x68] sm:$0xff] }
  0x50   :  { %v832_v50 = vpack.c.bf16 %v499_v49, %v498_v48 }
  0x52   :  { %803 = vmatpush3.bf16.msra.mxu1 %v802_v52  ;;  %v501_v52 = vld [vmem:[%s1090_s5 + $0x78] sm:$0xff] }
  0x53   :  { %805 = vmatprep.subr.bf16.mxu1 %v804_v55  ;;  %v836_v53 = vpack.c.bf16 %v501_v52, %v500_v51 }
  0x56   :  { %807 = vmatpush3.bf16.msra.mxu1 %v806_v58 }
 0x104   :  { %v167_v6 = vpop.f32.mrb[0].mxu1 }
 0x105   :  { %v168_v7 = vadd.f32 %v167_v6, %v77_v4  ;;  %v169_v8 = vpop.f32.mrb[1].mxu1 }
 0x106   :  { %v170_v10 = vadd.f32 %v169_v8, %v81_v5 }
 0x107   :  { %v255_v16 = vmax.f32 %v168_v7, 0.0 }
 0x108   :  { %v173_v14 = vpop.f32.mrb[2].mxu1  ;;  %v256_v15 = vmax.f32 %v170_v10, 0.0  ;;  %v598_v10 = vld [vmem:[%s1091_s6] ss:$0 sm:$0xff] }
 0x109   :  { %v174_v17 = vadd.f32 %v173_v14, %v77_v4  ;;  %v175_v0 = vpop.f32.mrb[3].mxu1 }
 0x10a   :  { %v176_v20 = vadd.f32 %v175_v0, %v81_v5  ;;  %398 = vmatprep.mubr.f32.mxu0 %v256_v15 }
 0x10b   :  { %399 = vmatmul.mubr.f32.vlgmr.msra.gmra.mrb[0].mxu0 %v255_v16  ;;  %v259_v26 = vmax.f32 %v174_v17, 0.0 }
 0x10c   :  { %v260_v24 = vmax.f32 %v176_v20, 0.0  ;;  %v244_v25 = vpop.f32.mrb[4].mxu1  ;;  %811 = vmatpush3.bf16.msra.mxu0 %v808_v61 }
 0x10d   :  { %v245_v27 = vadd.f32 %v244_v25, %v85_v18  ;;  %v246_v28 = vpop.f32.mrb[5].mxu1  ;;  %813 = vmatprep.subr.bf16.mxu0 %v812_v19 }
 0x10e   :  { %v247_v30 = vadd.f32 %v246_v28, %v89_v21  ;;  %403 = vmatprep.mubr.f32.mxu0 %v260_v24 }
 0x10f   :  { %404 = vmatmul.mubr.f32.gmra.mrb[2].mxu0 %v259_v26  ;;  %v257_v33 = vmax.f32 %v245_v27, 0.0 }
 0x110   :  { %v258_v31 = vmax.f32 %v247_v30, 0.0  ;;  %v250_v32 = vpop.f32.mrb[6].mxu1  ;;  %815 = vmatpush3.bf16.msra.mxu0 %v812_v19 }
 0x111   :  { %v251_v34 = vadd.f32 %v250_v32, %v85_v18  ;;  %v252_v35 = vpop.f32.mrb[7].mxu1  ;;  %817 = vmatprep.subr.bf16.mxu0 %v816_v29 }
 0x112   :  { %v253_v36 = vadd.f32 %v252_v35, %v89_v21  ;;  %473 = vmatprep.mubr.f32.mxu1 %v258_v31 }
 0x113   :  { %474 = vmatmul.mubr.f32.vlgmr.msra.gmra.mrb[8].mxu1 %v257_v33  ;;  %v261_v38 = vmax.f32 %v251_v34, 0.0 }
 0x114   :  { %v262_v37 = vmax.f32 %v253_v36, 0.0  ;;  %819 = vmatpush3.bf16.msra.mxu0 %v816_v29 }
 0x115   :  { %821 = vmatprep.subr.bf16.mxu0 %v820_v41 }
 0x116   :  { %478 = vmatprep.mubr.f32.mxu1 %v262_v37 }
 0x117   :  { %479 = vmatmul.mubr.f32.gmra.mrb[10].mxu1 %v261_v38 }
 0x118   :  { %823 = vmatpush3.bf16.msra.mxu0 %v820_v41 }
 0x119   :  { %825 = vmatprep.subr.bf16.mxu0 %v824_v44 }
 0x11c   :  { %827 = vmatpush3.bf16.msra.mxu0 %v824_v44 }
 0x11d   :  { %829 = vmatprep.subr.bf16.mxu0 %v828_v47 }
 0x120   :  { %831 = vmatpush3.bf16.msra.mxu0 %v828_v47 }
 0x121   :  { %833 = vmatprep.subr.bf16.mxu0 %v832_v50 }
 0x124   :  { %835 = vmatpush3.bf16.msra.mxu0 %v832_v50 }
 0x125   :  { %837 = vmatprep.subr.bf16.mxu0 %v836_v53 }
 0x128   :  { %839 = vmatpush3.bf16.msra.mxu0 %v836_v53 }
 0x1de   :  { %v631_v54 = vpop.f32.mrb[0].mxu0 }
 0x1df   :  { %v632_v55 = vpop.f32.mrb[1].mxu0 }
 0x1e0   :  { %v633_v56 = vadd.f32 %v632_v55, %v631_v54 }
 0x1e2   :  { %v634_v57 = vpop.f32.mrb[2].mxu0  ;;  %v401_v63 = vadd.f32 %v633_v56, %v597_v60 }
 0x1e3   :  { %v635_v58 = vpop.f32.mrb[3].mxu0 }
 0x1e4   :  { %v636_v59 = vadd.f32 %v635_v58, %v634_v57 }
 0x1e6   :  { %v669_v61 = vpop.f32.mrb[8].mxu1  ;;  %v406_v5 = vadd.f32 %v636_v59, %v597_v60 }
 0x1e7   :  { %v670_v62 = vpop.f32.mrb[9].mxu1 }
 0x1e8   :  { %v671_v1 = vadd.f32 %v670_v62, %v669_v61 }
 0x1ea   :  { %v476_v2 = vadd.f32 %v671_v1, %v401_v63  ;;  %v672_v3 = vpop.f32.mrb[10].mxu1 }
 0x1eb   :  { %v673_v4 = vpop.f32.mrb[11].mxu1 }
 0x1ec   :  { %v484_v6 = vmax.f32 %v476_v2, 0.0  ;;  %v674_v7 = vadd.f32 %v673_v4, %v672_v3 }
 0x1ee   :  { %v481_v8 = vadd.f32 %v674_v7, %v406_v5  ;;  %725 = vmatprep.mubr.f32.mxu0 %v484_v6 }
 0x1f0   :  { %v485_v9 = vmax.f32 %v481_v8, 0.0 }
 0x1f2   :  { %726 = vmatmul.mubr.f32.vlgmr.msra.gmra.mrb[4].mxu0 %v485_v9 }
 0x2c5   :  { %v727_v11 = vpop.f32.mrb[4].mxu0 }
 0x2c6   :  { %v581_v12 = vadd.f32 %v727_v11, %v598_v10  ;;  %v575_v13 = vpop.f32.mrb[5].mxu0 }
 0x2c7   :  { %v576_v14 = vadd.f32 %v598_v10, %v575_v13 }
 0x2c8   :  { %586 = vst.msk [vmem:[%s1092_s7 + $0x8] sm:$0xff] %vm584_vm1, %v581_v12 }
 0x2c9   :  { %585 = vst.msk [vmem:[%s1092_s7] sm:$0xff] %vm584_vm1, %v576_v14 }
 0x2ca   :  { %591 = vsyncpa [#allocation3], 1 }
 0x2cb   :  { %592 = vsyncpa [#allocation5], 1 }

</bundles_post_ra>
